<compile_context>
chip_gen: v5e
topology: v5e:2x2
jax: 0.10.0
libtpu: 0.0.40
codegen_flags: <defaults>
</compile_context>

<pallas_src>
import jax
import jax.numpy as jnp
from jax.experimental import pallas as pl
from jax.experimental.pallas import tpu as pltpu


# ---------------------------------------------------------------------------
# Fused Pallas kernel: one grid step == one RGCNConv layer.
# ---------------------------------------------------------------------------
def _node_rgcn_fused_kernel(adj_ref, w_ref, root_ref, bias_ref, x0_ref,
                            out_ref, x_sc):
    """
    adj_ref  : (1, B*N, N)  basis-combined, mean-normalized adjacency (layer l)
    w_ref    : (1, B*D, D)  vertically stacked basis weights           (layer l)
    root_ref : (1, D, D)    self-connection weight                     (layer l)
    bias_ref : (1, 1, D)    bias (f32)                                 (layer l)
    x0_ref   : (N, D)       raw input embeddings (layer-0 input, resident)
    out_ref  : (N, D)       resident output tile (carries activations across layers)
    x_sc     : (N, D)       VMEM scratch holding this layer's input
    """
    l = pl.program_id(0)
    N, D = out_ref.shape
    B = adj_ref.shape[1] // N

    # Layer input: raw embeddings for layer 0, relu(previous output) otherwise.
    # relu is applied once per layer (not once per relation/basis).
    @pl.when(l == 0)
    def _():
        x_sc[...] = x0_ref[...]

    @pl.when(l > 0)
    def _():
        x_sc[...] = jnp.maximum(out_ref[...], 0.0).astype(x_sc.dtype)

    x = x_sc[...]

    # Messages for ALL bases in one stacked MXU matmul:
    #   (B*N, N) @ (N, D) -> (B*N, D);  row block b is A'_b @ x.
    h = jnp.dot(adj_ref[0], x, preferred_element_type=jnp.float32)
    h = h.astype(x.dtype)

    # Self-connection + bias, accumulated in f32.
    acc = jnp.dot(x, root_ref[0], preferred_element_type=jnp.float32) + bias_ref[0]

    # Per-basis output transform; B is small and statically unrolled.  Slices
    # are static and sublane-aligned (N, D multiples of 8) so they stay views.
    w = w_ref[0]                                   # (B*D, D)
    for b in range(B):
        acc = acc + jnp.dot(h[b * N:(b + 1) * N, :],
                            w[b * D:(b + 1) * D, :],
                            preferred_element_type=jnp.float32)

    out_ref[...] = acc.astype(out_ref.dtype)


# ---------------------------------------------------------------------------
# Wrapper: dense mean-normalized adjacency, basis-combination, fused call.
# ---------------------------------------------------------------------------
def build_adjacency(edge_index, edge_type, num_nodes, num_relations):
    # TODO(synk): scatter-mean itself stays in XLA (dense adjacency build);
    # a Pallas gather/DMA formulation is only worthwhile for large sparse graphs.
    src, dst = edge_index[0], edge_index[1]
    adj = jnp.zeros((num_relations, num_nodes, num_nodes), jnp.float32)
    adj = adj.at[edge_type, dst, src].add(1.0)
    deg = adj.sum(axis=2, keepdims=True)                              # per-relation in-degree
    adj_norm = jnp.where(deg > 0, adj / jnp.maximum(deg, 1.0), 0.0)   # scatter-mean
    return adj_norm


def init_node_rgcn_params(key, num_layers, num_relations, num_bases, emb_dim):
    params = []
    for _ in range(num_layers):
        k1, k2, k3, key = jax.random.split(key, 4)
        params.append(dict(
            bases=0.1 * jax.random.normal(k1, (num_bases, emb_dim, emb_dim), jnp.float32),
            comp=0.1 * jax.random.normal(k2, (num_relations, num_bases), jnp.float32),
            root=0.1 * jax.random.normal(k3, (emb_dim, emb_dim), jnp.float32),
            bias=jnp.zeros((1, emb_dim), jnp.float32),
        ))
    return params


def node_rgcn_forward(params, edge_index, edge_type, embeddings,
                      num_nodes, num_relations, num_layers,
                      compute_dtype=jnp.float32):
    N = num_nodes
    D = embeddings.shape[1]
    num_used = max(1, num_layers - 1)     # layer 0, then layers 1..num_layers-2
    B = params[0]["bases"].shape[0]

    adj_norm = build_adjacency(edge_index, edge_type, N, num_relations)   # (R, N, N)

    # Per-layer basis-combined adjacency:  A'_{l,b} = sum_r comp_l[r,b] * A_r
    # (exact; shrinks the kernel reduction from R relations to B bases).
    comp_all = jnp.stack([params[i]["comp"] for i in range(num_used)])    # (L, R, B)
    adjB = jnp.einsum("lrb,rij->lbij", comp_all, adj_norm)
    adjB = adjB.reshape(num_used, B * N, N).astype(compute_dtype)         # (L, B*N, N)
    wB = jnp.stack([
        params[i]["bases"].reshape(B * D, D) for i in range(num_used)
    ]).astype(compute_dtype)                                              # (L, B*D, D)
    roots = jnp.stack([params[i]["root"] for i in range(num_used)]
                      ).astype(compute_dtype)                             # (L, D, D)
    biases = jnp.stack([params[i]["bias"] for i in range(num_used)]
                       ).astype(jnp.float32)                              # (L, 1, D)
    x0 = embeddings.astype(compute_dtype)

    flops = 2 * num_used * (B * N * N * D + B * N * D * D + N * D * D)
    bytes_accessed = int(
        adjB.size * adjB.dtype.itemsize + wB.size * wB.dtype.itemsize
        + roots.size * roots.dtype.itemsize + biases.size * biases.dtype.itemsize
        + x0.size * x0.dtype.itemsize + N * D * 4)

    # NOTE: for large N one would add a parallel dst-row tile axis (megacore),
    # tile the adjacency over src, and raise vmem_limit_bytes; at these shapes
    # a single resident (N, D) block per layer is optimal.
    return pl.pallas_call(
        _node_rgcn_fused_kernel,
        out_shape=jax.ShapeDtypeStruct((N, D), jnp.float32),
        grid_spec=pltpu.PrefetchScalarGridSpec(
            num_scalar_prefetch=0,
            grid=(num_used,),
            in_specs=[
                pl.BlockSpec((1, B * N, N), lambda l: (l, 0, 0)),   # per-layer adjacency
                pl.BlockSpec((1, B * D, D), lambda l: (l, 0, 0)),   # per-layer basis weights
                pl.BlockSpec((1, D, D), lambda l: (l, 0, 0)),       # per-layer root
                pl.BlockSpec((1, 1, D), lambda l: (l, 0, 0)),       # per-layer bias
                pl.BlockSpec((N, D), lambda l: (0, 0)),             # embeddings (resident)
            ],
            out_specs=pl.BlockSpec((N, D), lambda l: (0, 0)),       # resident across layers
            scratch_shapes=[pltpu.VMEM((N, D), compute_dtype)],
        ),
        compiler_params=pltpu.CompilerParams(
            dimension_semantics=("arbitrary",)),                    # layers are sequential
        cost_estimate=pl.CostEstimate(flops=flops, transcendentals=0,
                                      bytes_accessed=bytes_accessed),
    )(adjB, wB, roots, biases, x0)


# ---------------------------------------------------------------------------
# Pure-JAX reference (per-relation formulation) for in-script sanity check.
# ---------------------------------------------------------------------------
def _rgcn_layer_ref(x, adj_norm, weight, root, bias):
    h = jnp.einsum("rij,jd->rid", adj_norm, x)
    return jnp.einsum("rnd,rde->ne", h, weight) + x @ root + bias


def node_rgcn_ref(params, edge_index, edge_type, embeddings,
                  num_nodes, num_relations, num_layers):
    adj_norm = build_adjacency(edge_index, edge_type, num_nodes, num_relations)
    p = params[0]
    w = jnp.einsum("rb,bio->rio", p["comp"], p["bases"])
    x = _rgcn_layer_ref(embeddings, adj_norm, w, p["root"], p["bias"])
    for i in range(1, num_layers - 1):
        p = params[i]
        w = jnp.einsum("rb,bio->rio", p["comp"], p["bases"])
        x = _rgcn_layer_ref(jnp.maximum(x, 0.0), adj_norm, w, p["root"], p["bias"])
    return x


if __name__ == "__main__":
    num_nodes = 64
    num_relations = 4
    num_bases = 2
    num_layers = 3          # 3 layers constructed; forward uses layers 0 and 1
    emb_dim = 32
    num_edges = 128

    key = jax.random.PRNGKey(0)
    k_emb, k_src, k_dst, k_typ, k_par = jax.random.split(key, 5)

    embeddings = jax.random.normal(k_emb, (num_nodes, emb_dim), jnp.float32)
    edge_index = jnp.stack([
        jax.random.randint(k_src, (num_edges,), 0, num_nodes),
        jax.random.randint(k_dst, (num_edges,), 0, num_nodes),
    ], axis=0)
    edge_type = jax.random.randint(k_typ, (num_edges,), 0, num_relations)

    params = init_node_rgcn_params(k_par, num_layers, num_relations, num_bases, emb_dim)

    out = node_rgcn_forward(params, edge_index, edge_type, embeddings,
                            num_nodes, num_relations, num_layers)
    out = jax.block_until_ready(out)

    ref = node_rgcn_ref(params, edge_index, edge_type, embeddings,
                        num_nodes, num_relations, num_layers)
    assert out.shape == (num_nodes, emb_dim)
    assert jnp.allclose(out, ref, atol=1e-4, rtol=1e-4)

    print("KERNEL_OK")
</pallas_src>

<mosaic_0001>
module attributes {stable_mosaic.version = 11 : i64} {
  func.func @_node_rgcn_fused_kernel(%arg0: i32, %arg1: memref<1x128x64xf32, #tpu.memory_space<vmem>>, %arg2: memref<1x64x32xf32, #tpu.memory_space<vmem>>, %arg3: memref<1x32x32xf32, #tpu.memory_space<vmem>>, %arg4: memref<1x1x32xf32, #tpu.memory_space<vmem>>, %arg5: memref<64x32xf32, #tpu.memory_space<vmem>>, %arg6: memref<64x32xf32, #tpu.memory_space<vmem>>, %arg7: memref<64x32xf32, #tpu.memory_space<vmem>>) attributes {dimension_semantics = [#tpu.dimension_semantics<arbitrary>], iteration_bounds = array<i64: 2>, scalar_prefetch = 0 : i64, scratch_operands = 1 : i64, tpu.core_type = #tpu.core_type<tc>, window_params = [{transform_indices = @transform_0, window_bounds = array<i64: 1, 128, 64>}, {transform_indices = @transform_1, window_bounds = array<i64: 1, 64, 32>}, {transform_indices = @transform_2, window_bounds = array<i64: 1, 32, 32>}, {transform_indices = @transform_3, window_bounds = array<i64: 1, 1, 32>}, {pipeline_mode = #tpu.pipeline_mode<synchronous>, transform_indices = @transform_4, window_bounds = array<i64: 64, 32>}, {pipeline_mode = #tpu.pipeline_mode<synchronous>, transform_indices = @transform_5, window_bounds = array<i64: 64, 32>}]} {
    %c0_i32 = arith.constant 0 : i32
    %0 = arith.cmpi eq, %arg0, %c0_i32 : i32
    %1 = arith.extui %0 : i1 to i32
    %c0_i32_0 = arith.constant 0 : i32
    %2 = arith.cmpi ne, %1, %c0_i32_0 : i32
    scf.if %2 {
      %c0_21 = arith.constant 0 : index
      %c0_22 = arith.constant 0 : index
      %28 = vector.load %arg5[%c0_21, %c0_22] : memref<64x32xf32, #tpu.memory_space<vmem>>, vector<64x32xf32>
      %c0_23 = arith.constant 0 : index
      %c0_24 = arith.constant 0 : index
      %29 = vector.load %arg7[%c0_23, %c0_24] : memref<64x32xf32, #tpu.memory_space<vmem>>, vector<64x32xf32>
      tpu.vector_store %arg7[%c0_23, %c0_24], %28 {strides = array<i32>} : memref<64x32xf32, #tpu.memory_space<vmem>>, vector<64x32xf32>,
    } else {
    }
    %c0_i32_1 = arith.constant 0 : i32
    %3 = arith.cmpi sgt, %arg0, %c0_i32_1 : i32
    %4 = arith.extui %3 : i1 to i32
    %c0_i32_2 = arith.constant 0 : i32
    %5 = arith.cmpi ne, %4, %c0_i32_2 : i32
    scf.if %5 {
      %c0_21 = arith.constant 0 : index
      %c0_22 = arith.constant 0 : index
      %28 = vector.load %arg6[%c0_21, %c0_22] : memref<64x32xf32, #tpu.memory_space<vmem>>, vector<64x32xf32>
      %cst_23 = arith.constant 0.000000e+00 : f32
      %29 = vector.broadcast %cst_23 : f32 to vector<64x32xf32>
      %30 = arith.maximumf %28, %29 : vector<64x32xf32>
      %c0_24 = arith.constant 0 : index
      %c0_25 = arith.constant 0 : index
      %31 = vector.load %arg7[%c0_24, %c0_25] : memref<64x32xf32, #tpu.memory_space<vmem>>, vector<64x32xf32>
      tpu.vector_store %arg7[%c0_24, %c0_25], %30 {strides = array<i32>} : memref<64x32xf32, #tpu.memory_space<vmem>>, vector<64x32xf32>,
    } else {
    }
    %c0 = arith.constant 0 : index
    %c0_3 = arith.constant 0 : index
    %6 = vector.load %arg7[%c0, %c0_3] : memref<64x32xf32, #tpu.memory_space<vmem>>, vector<64x32xf32>
    %c0_4 = arith.constant 0 : index
    %c0_5 = arith.constant 0 : index
    %c0_6 = arith.constant 0 : index
    %7 = vector.load %arg1[%c0_4, %c0_5, %c0_6] : memref<1x128x64xf32, #tpu.memory_space<vmem>>, vector<1x128x64xf32>
    %8 = vector.shape_cast %7 : vector<1x128x64xf32> to vector<128x64xf32>
    %cst = arith.constant dense<0.000000e+00> : vector<128x32xf32>
    %9 = tpu.matmul %8, %6, %cst {dimension_numbers = #tpu.dot_dimension_numbers<[1], [0], [0], [1], [0, 0, 1, 1], [], []>} : vector<128x64xf32>, vector<64x32xf32>, vector<128x32xf32> -> vector<128x32xf32>
    %c0_7 = arith.constant 0 : index
    %c0_8 = arith.constant 0 : index
    %c0_9 = arith.constant 0 : index
    %10 = vector.load %arg3[%c0_7, %c0_8, %c0_9] : memref<1x32x32xf32, #tpu.memory_space<vmem>>, vector<1x32x32xf32>
    %11 = vector.shape_cast %10 : vector<1x32x32xf32> to vector<32x32xf32>
    %cst_10 = arith.constant dense<0.000000e+00> : vector<64x32xf32>
    %12 = tpu.matmul %6, %11, %cst_10 {dimension_numbers = #tpu.dot_dimension_numbers<[1], [0], [0], [1], [0, 0, 1, 1], [], []>} : vector<64x32xf32>, vector<32x32xf32>, vector<64x32xf32> -> vector<64x32xf32>
    %c0_11 = arith.constant 0 : index
    %c0_12 = arith.constant 0 : index
    %c0_13 = arith.constant 0 : index
    %13 = vector.load %arg4[%c0_11, %c0_12, %c0_13] : memref<1x1x32xf32, #tpu.memory_space<vmem>>, vector<1x1x32xf32>
    %14 = vector.shape_cast %13 : vector<1x1x32xf32> to vector<1x32xf32>
    %15 = vector.broadcast %14 : vector<1x32xf32> to vector<64x32xf32>
    %16 = arith.addf %12, %15 : vector<64x32xf32>
    %c0_14 = arith.constant 0 : index
    %c0_15 = arith.constant 0 : index
    %c0_16 = arith.constant 0 : index
    %17 = vector.load %arg2[%c0_14, %c0_15, %c0_16] : memref<1x64x32xf32, #tpu.memory_space<vmem>>, vector<1x64x32xf32>
    %18 = vector.shape_cast %17 : vector<1x64x32xf32> to vector<64x32xf32>
    %19 = vector.extract_strided_slice %9 {offsets = [0, 0], sizes = [64, 32], strides = [1, 1]} : vector<128x32xf32> to vector<64x32xf32>
    %20 = vector.extract_strided_slice %18 {offsets = [0, 0], sizes = [32, 32], strides = [1, 1]} : vector<64x32xf32> to vector<32x32xf32>
    %cst_17 = arith.constant dense<0.000000e+00> : vector<64x32xf32>
    %21 = tpu.matmul %19, %20, %cst_17 {dimension_numbers = #tpu.dot_dimension_numbers<[1], [0], [0], [1], [0, 0, 1, 1], [], []>} : vector<64x32xf32>, vector<32x32xf32>, vector<64x32xf32> -> vector<64x32xf32>
    %22 = arith.addf %16, %21 : vector<64x32xf32>
    %23 = vector.extract_strided_slice %9 {offsets = [64, 0], sizes = [64, 32], strides = [1, 1]} : vector<128x32xf32> to vector<64x32xf32>
    %24 = vector.extract_strided_slice %18 {offsets = [32, 0], sizes = [32, 32], strides = [1, 1]} : vector<64x32xf32> to vector<32x32xf32>
    %cst_18 = arith.constant dense<0.000000e+00> : vector<64x32xf32>
    %25 = tpu.matmul %23, %24, %cst_18 {dimension_numbers = #tpu.dot_dimension_numbers<[1], [0], [0], [1], [0, 0, 1, 1], [], []>} : vector<64x32xf32>, vector<32x32xf32>, vector<64x32xf32> -> vector<64x32xf32>
    %26 = arith.addf %22, %25 : vector<64x32xf32>
    %c0_19 = arith.constant 0 : index
    %c0_20 = arith.constant 0 : index
    %27 = vector.load %arg6[%c0_19, %c0_20] : memref<64x32xf32, #tpu.memory_space<vmem>>, vector<64x32xf32>
    tpu.vector_store %arg6[%c0_19, %c0_20], %26 {strides = array<i32>} : memref<64x32xf32, #tpu.memory_space<vmem>>, vector<64x32xf32>,
    return
  }
  func.func @transform_0(%arg0: i32) -> (i32, i32, i32) {
    %c0_i32 = arith.constant 0 : i32
    %c0_i32_0 = arith.constant 0 : i32
    %c0_i32_1 = arith.constant 0 : i32
    return %arg0, %c0_i32, %c0_i32_0 : i32, i32, i32
  }
  func.func @transform_1(%arg0: i32) -> (i32, i32, i32) {
    %c0_i32 = arith.constant 0 : i32
    %c0_i32_0 = arith.constant 0 : i32
    %c0_i32_1 = arith.constant 0 : i32
    return %arg0, %c0_i32, %c0_i32_0 : i32, i32, i32
  }
  func.func @transform_2(%arg0: i32) -> (i32, i32, i32) {
    %c0_i32 = arith.constant 0 : i32
    %c0_i32_0 = arith.constant 0 : i32
    %c0_i32_1 = arith.constant 0 : i32
    return %arg0, %c0_i32, %c0_i32_0 : i32, i32, i32
  }
  func.func @transform_3(%arg0: i32) -> (i32, i32, i32) {
    %c0_i32 = arith.constant 0 : i32
    %c0_i32_0 = arith.constant 0 : i32
    %c0_i32_1 = arith.constant 0 : i32
    return %arg0, %c0_i32, %c0_i32_0 : i32, i32, i32
  }
  func.func @transform_4(%arg0: i32) -> (i32, i32) {
    %c0_i32 = arith.constant 0 : i32
    %c0_i32_0 = arith.constant 0 : i32
    %c0_i32_1 = arith.constant 0 : i32
    return %c0_i32, %c0_i32_0 : i32, i32
  }
  func.func @transform_5(%arg0: i32) -> (i32, i32) {
    %c0_i32 = arith.constant 0 : i32
    %c0_i32_0 = arith.constant 0 : i32
    %c0_i32_1 = arith.constant 0 : i32
    return %c0_i32, %c0_i32_0 : i32, i32
  }
}

</mosaic_0001>

<bundles_post_ra>
// kernel: tpu_custom_call.1
= control target key start
LH: loop header
LB: loop body
LE: loop exit
PB: predicated region body
PF: predicated region fallthrough
CT: control target
= control target key end

     0   :  { %s869_s18 = smov 0   ;;  %s1101_s0 = inlined_call_operand.vmem [shape: f32[2,128,64], index: 0, kind: input, shape index: {}]   ;;  %s1102_s1 = inlined_call_operand.vmem [shape: f32[2,64,32], index: 1, kind: input, shape index: {}]   ;;  %s1103_s2 = inlined_call_operand.vmem [shape: f32[2,32,32], index: 2, kind: input, shape index: {}]   ;;  %s1104_s3 = inlined_call_operand.vmem [shape: f32[2,1,32], index: 3, kind: input, shape index: {}]   ;;  %s1105_s4 = inlined_call_operand.vmem [shape: f32[64,32], index: 4, kind: input, shape index: {}]   ;;  %s1106_s5 = inlined_call_operand.vmem [shape: f32[64,32], index: 5, kind: output, shape index: {}]  }
   0x1 LB: > { %s875_s19 = sadd.s32 4294967295, %s837_s18   ;;  %p752_p0 = scmp.ge.s32.totalorder %s837_s18, 1  ;;  %s837_s18 = sphi %s869_s18, %s15_s18  }
   0x2   : > { %p210_p1 = scmp.lt.s32.totalorder %s837_s18, 3 }
   0x4   : > { %p211_p2 = pnand %p752_p0, %p210_p1 }
   0x5   : > { %p246_p3 = scmp.lt.s32.totalorder (!%p211_p2), %s875_s19, 1  ;;  %p759_p4 = scmp.ne.s32.totalorder (!%p211_p2), %s875_s19, 0 }
   0x6   : > { %214 = sbr.rel (%p211_p2) target bundleno = 447 (0x1bf), region = 40 }
   0xb   : > { %s881_s20 = scalar_select %p246_p3, %s875_s19, 1 }
   0xc   : > { %267 = sbr.rel (%p759_p4) target bundleno = 26 (0x1a), region = 44 }
   0xd   : > { %s803_s21 = sshll.u32 %s881_s20, 7  ;;  %s804_s22 = sshll.u32 %s881_s20, 6 }
   0xe   : > { %s888_s25 = scalar_lea.vmem %s1101_s0, %s803_s21  ;;  %s893_s28 = scalar_lea.vmem %s1102_s1, %s804_s22 }
   0xf   : > { %s805_s29 = sshll.u32 %s881_s20, 5  ;;  %s263_s7 = scalar_lea.vmem %s1104_s3, %s881_s20 }
  0x10   : > { %s903_s10 = scalar_lea.vmem %s1103_s2, %s805_s29 }
  0x11   : > { %v268_v0 = vld [vmem:[%s1105_s4] sm:$0xff]  ;;  %vm276_vm0 = vcmask 261120   ;;  %v269_v1 = vld [vmem:[%s1105_s4 + $0x8] sm:$0xff]  ;;  %v270_v2 = vld [vmem:[%s1105_s4 + $0x10] sm:$0xff] }
  0x12   : > { %277 = vst.msk [vmem:[#allocation2] sm:$0xff] %vm276_vm0, %v268_v0  ;;  %v271_v3 = vld [vmem:[%s1105_s4 + $0x18] sm:$0xff]  ;;  %v272_v4 = vld [vmem:[%s1105_s4 + $0x20] sm:$0xff]  ;;  %v273_v5 = vld [vmem:[%s1105_s4 + $0x28] sm:$0xff] }
  0x13   : > { %278 = vst.msk [vmem:[#allocation2 + $0x8] sm:$0xff] %vm276_vm0, %v269_v1  ;;  %v274_v6 = vld [vmem:[%s1105_s4 + $0x30] sm:$0xff]  ;;  %v275_v7 = vld [vmem:[%s1105_s4 + $0x38] sm:$0xff] }
  0x14   : > { %279 = vst.msk [vmem:[#allocation2 + $0x10] sm:$0xff] %vm276_vm0, %v270_v2 }
  0x15   : > { %280 = vst.msk [vmem:[#allocation2 + $0x18] sm:$0xff] %vm276_vm0, %v271_v3 }
  0x16   : > { %281 = vst.msk [vmem:[#allocation2 + $0x20] sm:$0xff] %vm276_vm0, %v272_v4 }
  0x17   : > { %282 = vst.msk [vmem:[#allocation2 + $0x28] sm:$0xff] %vm276_vm0, %v273_v5 }
  0x18   : > { %283 = vst.msk [vmem:[#allocation2 + $0x30] sm:$0xff] %vm276_vm0, %v274_v6 }
  0x19   : > { %284 = vst.msk [vmem:[#allocation2 + $0x38] sm:$0xff] %vm276_vm0, %v275_v7 }
  0x1a PF: > { %p760_p5 = scmp.le.s32.totalorder %s875_s19, 0 }
  0x1c   : > { %288 = sbr.rel (%p760_p5) target bundleno = 44 (0x2c), region = 48 }
  0x21   : > { %v289_v8 = vld [vmem:[%s1106_s5] sm:$0xff]  ;;  %vm305_vm1 = vcmask 261120   ;;  %v290_v9 = vld [vmem:[%s1106_s5 + $0x8] sm:$0xff]  ;;  %v291_v10 = vld [vmem:[%s1106_s5 + $0x10] sm:$0xff] }
  0x22   : > { %v297_v11 = vmax.f32 %v289_v8, 0.0  ;;  %v298_v12 = vmax.f32 %v290_v9, 0.0  ;;  %v299_v13 = vmax.f32 %v291_v10, 0.0  ;;  %v292_v14 = vld [vmem:[%s1106_s5 + $0x18] sm:$0xff]  ;;  %v293_v15 = vld [vmem:[%s1106_s5 + $0x20] sm:$0xff]  ;;  %v294_v16 = vld [vmem:[%s1106_s5 + $0x28] sm:$0xff] }
  0x23   : > { %v300_v17 = vmax.f32 %v292_v14, 0.0  ;;  %v295_v18 = vld [vmem:[%s1106_s5 + $0x30] sm:$0xff]  ;;  %v301_v19 = vmax.f32 %v293_v15, 0.0  ;;  %v296_v20 = vld [vmem:[%s1106_s5 + $0x38] sm:$0xff]  ;;  %v302_v21 = vmax.f32 %v294_v16, 0.0 }
  0x24   : > { %306 = vst.msk [vmem:[#allocation2] sm:$0xff] %vm305_vm1, %v297_v11  ;;  %v303_v22 = vmax.f32 %v295_v18, 0.0  ;;  %v304_v23 = vmax.f32 %v296_v20, 0.0 }
  0x25   : > { %307 = vst.msk [vmem:[#allocation2 + $0x8] sm:$0xff] %vm305_vm1, %v298_v12 }
  0x26   : > { %308 = vst.msk [vmem:[#allocation2 + $0x10] sm:$0xff] %vm305_vm1, %v299_v13 }
  0x27   : > { %309 = vst.msk [vmem:[#allocation2 + $0x18] sm:$0xff] %vm305_vm1, %v300_v17 }
  0x28   : > { %310 = vst.msk [vmem:[#allocation2 + $0x20] sm:$0xff] %vm305_vm1, %v301_v19 }
  0x29   : > { %311 = vst.msk [vmem:[#allocation2 + $0x28] sm:$0xff] %vm305_vm1, %v302_v21 }
  0x2a   : > { %312 = vst.msk [vmem:[#allocation2 + $0x30] sm:$0xff] %vm305_vm1, %v303_v22 }
  0x2b   : > { %313 = vst.msk [vmem:[#allocation2 + $0x38] sm:$0xff] %vm305_vm1, %v304_v23 }
  0x2c PF: > { %v977_v30 = vld [vmem:[#allocation2 + $0x8] sm:$0xff]  ;;  %v981_v31 = vld [vmem:[#allocation2] sm:$0xff]  ;;  %vm338_vm2 = vcmask 523264   ;;  %v324_v34 = vld [vmem:[%s888_s25 + $0x10] sm:$0xff]  ;;  %vm460_vm3 = vcmask 261120  }
  0x2d   : > { %v973_v29 = vld [vmem:[#allocation2 + $0x10] sm:$0xff]  ;;  %v322_v32 = vld [vmem:[%s888_s25] sm:$0xff]  ;;  %v323_v33 = vld [vmem:[%s888_s25 + $0x8] sm:$0xff] }
  0x2e   : > { %v971_v28 = vld [vmem:[#allocation2 + $0x18] sm:$0xff]  ;;  %v326_v36 = vld [vmem:[%s888_s25 + $0x20] sm:$0xff]  ;;  %v327_v37 = vld [vmem:[%s888_s25 + $0x28] sm:$0xff] }
  0x2f   : > { %v318_v27 = vld [vmem:[#allocation2 + $0x20] sm:$0xff]  ;;  %v325_v35 = vld [vmem:[%s888_s25 + $0x18] sm:$0xff]  ;;  %v332_v38 = vld [vmem:[%s888_s25 + $0x50] sm:$0xff] }
  0x30   : > { %v319_v26 = vld [vmem:[#allocation2 + $0x28] sm:$0xff]  ;;  %v455_v39 = vld [vmem:[%s903_s10 + $0x18] sm:$0xff]  ;;  %v454_v40 = vld [vmem:[%s903_s10 + $0x10] sm:$0xff] }
  0x31   : > { %v965_v25 = vld [vmem:[#allocation2 + $0x30] sm:$0xff]  ;;  %814 = vmatpush.msra.mxu2 %v455_v39  ;;  %v453_v41 = vld [vmem:[%s903_s10 + $0x8] sm:$0xff]  ;;  %815 = vmatpush.msra.mxu3 %v455_v39  ;;  %v452_v43 = vld [vmem:[%s903_s10] sm:$0xff] }
  0x32   : > { %v963_v24 = vld [vmem:[#allocation2 + $0x38] sm:$0xff]  ;;  %v328_v42 = vld [vmem:[%s888_s25 + $0x30] sm:$0xff]  ;;  %v527_v47 = vld [vmem:[%s893_s28 + $0x8] sm:$0xff] }
  0x33   : > { %395 = vmatpush.msra.mxu0 %v963_v24  ;;  %806 = vmatpush.msra.mxu1 %v963_v24  ;;  %v333_v44 = vld [vmem:[%s888_s25 + $0x58] sm:$0xff]  ;;  %v528_v46 = vld [vmem:[%s893_s28 + $0x10] sm:$0xff]  ;;  %v334_v49 = vld [vmem:[%s888_s25 + $0x60] sm:$0xff] }
  0x34   : > { %816 = vmatpush.msra.mxu2 %v454_v40  ;;  %817 = vmatpush.msra.mxu3 %v454_v40  ;;  %v529_v45 = vld [vmem:[%s893_s28 + $0x18] sm:$0xff]  ;;  %v330_v50 = vld [vmem:[%s888_s25 + $0x40] sm:$0xff]  ;;  %v335_v51 = vld [vmem:[%s888_s25 + $0x68] sm:$0xff] }
  0x35   : > { %396 = vmatpush.msra.mxu0 %v965_v25  ;;  %807 = vmatpush.msra.mxu1 %v965_v25  ;;  %v329_v48 = vld [vmem:[%s888_s25 + $0x38] sm:$0xff]  ;;  %v331_v52 = vld [vmem:[%s888_s25 + $0x48] sm:$0xff]  ;;  %v336_v53 = vld [vmem:[%s888_s25 + $0x70] sm:$0xff] }
  0x36   : > { %818 = vmatpush.msra.mxu2 %v453_v41  ;;  %819 = vmatpush.msra.mxu3 %v453_v41  ;;  %v337_v54 = vld [vmem:[%s888_s25 + $0x78] sm:$0xff]  ;;  %v526_v55 = vld [vmem:[%s893_s28] sm:$0xff]  ;;  %v532_v59 = vld [vmem:[%s893_s28 + $0x30] sm:$0xff] }
  0x37   : > { %397 = vmatpush.msra.mxu0 %v319_v26  ;;  %808 = vmatpush.msra.mxu1 %v319_v26  ;;  %v533_v58 = vld [vmem:[%s893_s28 + $0x38] sm:$0xff]  ;;  %v531_v61 = vld [vmem:[%s893_s28 + $0x28] sm:$0xff]  ;;  %v530_v63 = vld [vmem:[%s893_s28 + $0x20] sm:$0xff] }
  0x38   : > { %820 = vmatpush.msra.mxu2 %v452_v43  ;;  %821 = vmatpush.msra.mxu3 %v452_v43  ;;  %v830_v17 = vld [vmem:[%s263_s7] ss:$0 sm:$0xff] }
  0x39   : > { %398 = vmatpush.msra.mxu0 %v318_v27  ;;  %809 = vmatpush.msra.mxu1 %v318_v27 }
  0x3a   : > { %781 = vmatmul.msk.f32.vlgmr.msra.gmra.mxu2 %vm460_vm3, %v318_v27  ;;  %782 = vmatmul.msk.f32.vlgmr.msra.gmra.mxu3 %vm460_vm3, %v319_v26 }
  0x3b   : > { %399 = vmatpush.msra.mxu0 %v971_v28  ;;  %810 = vmatpush.msra.mxu1 %v971_v28 }
  0x3c   : > { %570 = vmatpush.msrb.mxu2 %v529_v45  ;;  %643 = vmatpush.msrb.mxu3 %v533_v58 }
  0x3d   : > { %400 = vmatpush.msra.mxu0 %v973_v29  ;;  %811 = vmatpush.msra.mxu1 %v973_v29 }
  0x3e   : > { %571 = vmatpush.msrb.mxu2 %v528_v46  ;;  %644 = vmatpush.msrb.mxu3 %v532_v59 }
  0x3f   : > { %401 = vmatpush.msra.mxu0 %v977_v30  ;;  %812 = vmatpush.msra.mxu1 %v977_v30 }
  0x40   : > { %572 = vmatpush.msrb.mxu2 %v527_v47  ;;  %645 = vmatpush.msrb.mxu3 %v531_v61 }
  0x41   : > { %402 = vmatpush.msra.mxu0 %v981_v31  ;;  %813 = vmatpush.msra.mxu1 %v981_v31 }
  0x42   : > { %761 = vmatmul.msk.f32.vlgmr.msra.gmra.mxu0 %vm338_vm2, %v322_v32  ;;  %771 = vmatmul.msk.f32.vlgmr.msra.gmra.mxu1 %vm338_vm2, %v332_v38 }
  0x43   : > { %497 = vmatpush.msrb.mxu1 %v455_v39  ;;  %783 = vmatmul.msk.f32.gmra.mxu3 %vm460_vm3, %v965_v25 }
  0x44   : > { %573 = vmatpush.msrb.mxu2 %v526_v55  ;;  %646 = vmatpush.msrb.mxu3 %v530_v63 }
  0x45   : > { %498 = vmatpush.msrb.mxu1 %v454_v40 }
  0x47   : > { %499 = vmatpush.msrb.mxu1 %v453_v41 }
  0x49   : > { %500 = vmatpush.msrb.mxu1 %v452_v43 }
  0x4a   : > { %762 = vmatmul.msk.f32.gmra.mxu0 %vm338_vm2, %v323_v33  ;;  %772 = vmatmul.msk.f32.gmra.mxu1 %vm338_vm2, %v333_v44 }
  0x4b   : > { %784 = vmatmul.msk.f32.gmra.mxu3 %vm460_vm3, %v963_v24 }
  0x52   : > { %763 = vmatmul.msk.f32.gmra.mxu0 %vm338_vm2, %v324_v34  ;;  %773 = vmatmul.msk.f32.gmra.mxu1 %vm338_vm2, %v334_v49 }
  0x5a   : > { %764 = vmatmul.msk.f32.gmra.mxu0 %vm338_vm2, %v325_v35  ;;  %774 = vmatmul.msk.f32.gmra.mxu1 %vm338_vm2, %v335_v51 }
  0x62   : > { %765 = vmatmul.msk.f32.gmra.mxu0 %vm338_vm2, %v326_v36  ;;  %775 = vmatmul.msk.f32.gmra.mxu1 %vm338_vm2, %v336_v53 }
  0x6a   : > { %766 = vmatmul.msk.f32.gmra.mxu0 %vm338_vm2, %v327_v37  ;;  %776 = vmatmul.msk.f32.gmra.mxu1 %vm338_vm2, %v337_v54 }
  0x72   : > { %767 = vmatmul.msk.f32.gmra.mxu0 %vm338_vm2, %v328_v42  ;;  %777 = vmatmul.msk.f32.vlgmr.msrb.gmra.mxu1 %vm460_vm3, %v981_v31 }
  0x7a   : > { %768 = vmatmul.msk.f32.gmra.mxu0 %vm338_vm2, %v329_v48  ;;  %778 = vmatmul.msk.f32.gmra.mxu1 %vm460_vm3, %v977_v30 }
  0x82   : > { %769 = vmatmul.msk.f32.gmra.mxu0 %vm338_vm2, %v330_v50  ;;  %779 = vmatmul.msk.f32.gmra.mxu1 %vm460_vm3, %v973_v29 }
  0x8a   : > { %770 = vmatmul.msk.f32.gmra.mxu0 %vm338_vm2, %v331_v52  ;;  %780 = vmatmul.msk.f32.gmra.mxu1 %vm460_vm3, %v971_v28 }
  0xbd   : > { %v514_v12 = vpop.f32.mrf.mxu2  ;;  %v517_v13 = vpop.f32.mrf.mxu3 }
  0xbe   : > { %v515_v42 = vadd.f32 %v830_v17, %v514_v12  ;;  %v518_v47 = vadd.f32 %v830_v17, %v517_v13 }
  0xbf   : > { %v404_v56 = vpop.f32.mrf.mxu0  ;;  %v434_v5 = vpop.f32.mrf.mxu1 }
  0xc0   : > { %785 = vmatmul.msk.f32.vlgmr.msrb.gmra.mxu2 %vm460_vm3, %v404_v56 }
  0xc6   : > { %v520_v15 = vpop.f32.mrf.mxu3 }
  0xc7   : > { %v407_v57 = vpop.f32.mrf.mxu0  ;;  %v437_v7 = vpop.f32.mrf.mxu1  ;;  %v521_v52 = vadd.f32 %v830_v17, %v520_v15 }
  0xc8   : > { %786 = vmatmul.msk.f32.gmra.mxu2 %vm460_vm3, %v407_v57 }
  0xce   : > { %v523_v19 = vpop.f32.mrf.mxu3 }
  0xcf   : > { %v410_v60 = vpop.f32.mrf.mxu0  ;;  %v440_v8 = vpop.f32.mrf.mxu1  ;;  %v524_v56 = vadd.f32 %v830_v17, %v523_v19 }
  0xd0   : > { %787 = vmatmul.msk.f32.gmra.mxu2 %vm460_vm3, %v410_v60 }
  0xd7   : > { %v413_v62 = vpop.f32.mrf.mxu0  ;;  %v443_v9 = vpop.f32.mrf.mxu1 }
  0xd8   : > { %788 = vmatmul.msk.f32.gmra.mxu2 %vm460_vm3, %v413_v62 }
  0xdf   : > { %v416_v0 = vpop.f32.mrf.mxu0  ;;  %v446_v10 = vpop.f32.mrf.mxu1 }
  0xe0   : > { %789 = vmatmul.msk.f32.gmra.mxu2 %vm460_vm3, %v416_v0 }
  0xe7   : > { %v419_v1 = vpop.f32.mrf.mxu0  ;;  %v449_v11 = vpop.f32.mrf.mxu1 }
  0xe8   : > { %790 = vmatmul.msk.f32.gmra.mxu2 %vm460_vm3, %v419_v1 }
  0xef   : > { %v422_v2 = vpop.f32.mrf.mxu0  ;;  %v502_v16 = vpop.f32.mrf.mxu1 }
  0xf0   : > { %791 = vmatmul.msk.f32.gmra.mxu2 %vm460_vm3, %v422_v2  ;;  %v503_v20 = vadd.f32 %v830_v17, %v502_v16 }
  0xf7   : > { %v425_v3 = vpop.f32.mrf.mxu0  ;;  %v505_v21 = vpop.f32.mrf.mxu1 }
  0xf8   : > { %792 = vmatmul.msk.f32.gmra.mxu2 %vm460_vm3, %v425_v3  ;;  %v506_v26 = vadd.f32 %v830_v17, %v505_v21 }
  0xff   : > { %v428_v4 = vpop.f32.mrf.mxu0  ;;  %v508_v27 = vpop.f32.mrf.mxu1 }
 0x100   : > { %793 = vmatmul.msk.f32.vlgmr.msrb.gmra.mxu3 %vm460_vm3, %v428_v4  ;;  %v509_v31 = vadd.f32 %v830_v17, %v508_v27 }
 0x107   : > { %v431_v6 = vpop.f32.mrf.mxu0  ;;  %v511_v34 = vpop.f32.mrf.mxu1 }
 0x108   : > { %794 = vmatmul.msk.f32.gmra.mxu3 %vm460_vm3, %v431_v6  ;;  %v512_v37 = vadd.f32 %v830_v17, %v511_v34 }
 0x110   : > { %795 = vmatmul.msk.f32.gmra.mxu3 %vm460_vm3, %v434_v5 }
 0x118   : > { %796 = vmatmul.msk.f32.gmra.mxu3 %vm460_vm3, %v437_v7 }
 0x120   : > { %797 = vmatmul.msk.f32.gmra.mxu3 %vm460_vm3, %v440_v8 }
 0x128   : > { %798 = vmatmul.msk.f32.gmra.mxu3 %vm460_vm3, %v443_v9 }
 0x130   : > { %799 = vmatmul.msk.f32.gmra.mxu3 %vm460_vm3, %v446_v10 }
 0x138   : > { %800 = vmatmul.msk.f32.gmra.mxu3 %vm460_vm3, %v449_v11 }
 0x143   : > { %v575_v14 = vpop.f32.mrf.mxu2 }
 0x144   : > { %v599_v22 = vadd.f32 %v575_v14, %v503_v20 }
 0x14b   : > { %v578_v18 = vpop.f32.mrf.mxu2 }
 0x14c   : > { %v600_v28 = vadd.f32 %v578_v18, %v506_v26 }
 0x153   : > { %v581_v25 = vpop.f32.mrf.mxu2 }
 0x154   : > { %v601_v33 = vadd.f32 %v581_v25, %v509_v31 }
 0x15b   : > { %v584_v32 = vpop.f32.mrf.mxu2 }
 0x15c   : > { %v602_v39 = vadd.f32 %v584_v32, %v512_v37 }
 0x163   : > { %v587_v38 = vpop.f32.mrf.mxu2 }
 0x164   : > { %v603_v43 = vadd.f32 %v587_v38, %v515_v42 }
 0x16b   : > { %v590_v44 = vpop.f32.mrf.mxu2 }
 0x16c   : > { %v604_v48 = vadd.f32 %v590_v44, %v518_v47 }
 0x173   : > { %v593_v51 = vpop.f32.mrf.mxu2 }
 0x174   : > { %v605_v53 = vadd.f32 %v593_v51, %v521_v52 }
 0x17b   : > { %v596_v57 = vpop.f32.mrf.mxu2 }
 0x17c   : > { %v606_v58 = vadd.f32 %v596_v57, %v524_v56 }
 0x183   : > { %v648_v23 = vpop.f32.mrf.mxu3 }
 0x184   : > { %v672_v24 = vadd.f32 %v648_v23, %v599_v22 }
 0x186   : > { %680 = vst.msk [vmem:[%s1106_s5] sm:$0xff] %vm460_vm3, %v672_v24 }
 0x18b   : > { %v651_v29 = vpop.f32.mrf.mxu3 }
 0x18c   : > { %v673_v30 = vadd.f32 %v651_v29, %v600_v28 }
 0x18e   : > { %681 = vst.msk [vmem:[%s1106_s5 + $0x8] sm:$0xff] %vm460_vm3, %v673_v30 }
 0x193   : > { %v654_v35 = vpop.f32.mrf.mxu3 }
 0x194   : > { %v674_v36 = vadd.f32 %v654_v35, %v601_v33 }
 0x196   : > { %682 = vst.msk [vmem:[%s1106_s5 + $0x10] sm:$0xff] %vm460_vm3, %v674_v36 }
 0x19b   : > { %v657_v40 = vpop.f32.mrf.mxu3 }
 0x19c   : > { %v675_v41 = vadd.f32 %v657_v40, %v602_v39 }
 0x19e   : > { %683 = vst.msk [vmem:[%s1106_s5 + $0x18] sm:$0xff] %vm460_vm3, %v675_v41 }
 0x1a3   : > { %v660_v45 = vpop.f32.mrf.mxu3 }
 0x1a4   : > { %v676_v46 = vadd.f32 %v660_v45, %v603_v43 }
 0x1a6   : > { %684 = vst.msk [vmem:[%s1106_s5 + $0x20] sm:$0xff] %vm460_vm3, %v676_v46 }
 0x1ab   : > { %v663_v49 = vpop.f32.mrf.mxu3 }
 0x1ac   : > { %v677_v50 = vadd.f32 %v663_v49, %v604_v48 }
 0x1ae   : > { %685 = vst.msk [vmem:[%s1106_s5 + $0x28] sm:$0xff] %vm460_vm3, %v677_v50 }
 0x1b3   : > { %v666_v54 = vpop.f32.mrf.mxu3 }
 0x1b4   : > { %v678_v55 = vadd.f32 %v666_v54, %v605_v53 }
 0x1b6   : > { %686 = vst.msk [vmem:[%s1106_s5 + $0x30] sm:$0xff] %vm460_vm3, %v678_v55 }
 0x1bb   : > { %v669_v59 = vpop.f32.mrf.mxu3 }
 0x1bc   : > { %v679_v60 = vadd.f32 %v669_v59, %v606_v58 }
 0x1be   : > { %687 = vst.msk [vmem:[%s1106_s5 + $0x38] sm:$0xff] %vm460_vm3, %v679_v60 }
 0x1bf PF: > { %s15_s18 = sadd.s32 1, %s837_s18  }
 0x1c0   : > { %p12_p6 = scmp.ge.s32.totalorder %s15_s18, 4  }
 0x1c2   :  { %14 = sbr.rel (!%p12_p6) target bundleno = 1 (0x1), region = 83 }

</bundles_post_ra>
